<compile_context>
chip_gen: v7x
topology: tpu7x:2x2x1
jax: 0.10.0
libtpu: 0.0.40
codegen_flags: <defaults>
</compile_context>

<pallas_src>
import jax
import jax.numpy as jnp
from jax.experimental import pallas as pl
from jax.experimental.pallas import tpu as pltpu


_INV_SQRT2 = 0.7071067811865476


def _gelu_exact(h):
    # exact (erf) GELU — matches torch.nn.GELU() default, but lowers to a long
    # VPU polynomial on TPU (no hardware erf).  Use only for torch parity.
    return 0.5 * h * (1.0 + jax.lax.erf(h * _INV_SQRT2))


def _gelu_tanh(h):
    # tanh-approx GELU routes the transcendental to the EUP (its own VLIW slot).
    return jax.nn.gelu(h, approximate=True)


def _round_up(x, m):
    return ((x + m - 1) // m) * m


def _pick_tile(total, target, unit):
    """Largest tile <= target that is a multiple of `unit` and divides `total`.
    Falls back to the full extent (always a legal BlockSpec)."""
    if total % unit != 0 or total <= unit:
        return total
    t = (min(target, total) // unit) * unit
    while t >= unit:
        if total % t == 0:
            return t
        t -= unit
    return total


def _tpu_budget():
    """(scoped VMEM budget bytes, row-tile target) per TPU generation."""
    try:
        vmem_cap = int(pltpu.get_tpu_info().vmem_capacity_bytes)
    except Exception:
        vmem_cap = 128 * 1024 * 1024
    if vmem_cap <= 64 * 1024 * 1024:
        # v7x-like: 64 MiB physical VMEM per TC, 2 TCs -> leave headroom.
        return 48 * 1024 * 1024, 512
    # v5e / v6e: 128 MiB physical VMEM.
    return 96 * 1024 * 1024, 1024


def _choose_row_tile(n_rows, target):
    cap_full = _round_up(max(n_rows, 1), 8)
    # keep >= 2 row tiles so the "parallel" axis can shard across TensorCores
    cap_two = max(8, _round_up(-(-n_rows // 2), 8))
    tr = min(_round_up(max(int(target), 8), 8), cap_full, cap_two)
    return max(tr, 8)


def _vmem_estimate(tr, th, d_in, x_isz, o_isz, w_isz, mxu_isz, tiled):
    est = (2 * tr * d_in * x_isz          # x row tiles (double-buffered)
           + 2 * tr * d_in * o_isz        # out tiles
           + 2 * d_in * th * w_isz        # w_in tile
           + 2 * th * d_in * w_isz        # w_out tile
           + 2 * (th + d_in) * 4          # bias tiles (f32)
           + tr * th * 4                  # f32 hidden intermediate
           + tr * th * mxu_isz)           # cast copy of hidden for 2nd dot
    if tiled:
        est += tr * d_in * 4              # f32 accumulator scratch
        est += tr * d_in * mxu_isz        # cached cast of x tile
    return est


def project_in_out(x, w_in, b_in, w_out, b_out, *, fn=None,
                   tile_rows=None, tile_h=None, mxu_dtype=jnp.bfloat16):
    """Pallas ProjectInOut.forward with an elementwise fn.

    x:     (..., dim_in)
    w_in:  (dim_in, dim_out)   b_in:  (dim_out,)
    w_out: (dim_out, dim_in)   b_out: (dim_in,)

    NOTE: the hidden dim may be tiled, so `fn` must be strictly elementwise
    (default: tanh-approx GELU).  fn that mixes values across the hidden dim
    (softmax/norm/attention) must not be fused here.
    """
    if fn is None:
        fn = _gelu_tanh

    orig_shape = x.shape
    d_in = orig_shape[-1]
    d_hidden = w_in.shape[1]
    assert w_in.shape == (d_in, d_hidden)
    assert w_out.shape == (d_hidden, d_in)
    assert b_in.shape == (d_hidden,)
    assert b_out.shape == (d_in,)

    out_dtype = x.dtype
    if mxu_dtype is None:
        mxu_dtype = x.dtype

    # Store weights in the MXU dtype (halves weight DMA + VMEM when bf16).
    if jnp.dtype(mxu_dtype).itemsize < jnp.dtype(w_in.dtype).itemsize:
        w_in = w_in.astype(mxu_dtype)
        w_out = w_out.astype(mxu_dtype)

    # Biases as 2-D rows (kept f32 for exact bias/activation math).
    b_in2 = b_in.reshape(1, d_hidden).astype(jnp.float32)
    b_out2 = b_out.reshape(1, d_in).astype(jnp.float32)

    x2 = x.reshape(-1, d_in)
    n_rows = x2.shape[0]

    x_isz = jnp.dtype(x2.dtype).itemsize
    o_isz = jnp.dtype(out_dtype).itemsize
    w_isz = jnp.dtype(w_in.dtype).itemsize
    mxu_isz = jnp.dtype(mxu_dtype).itemsize

    budget, tr_target = _tpu_budget()
    if tile_rows is not None:
        tr_target = tile_rows
    tr = _choose_row_tile(n_rows, tr_target)

    # Hidden tiling: keep whole weight matrices resident in VMEM when they fit
    # (constant block index -> DMA'd once for the entire grid); otherwise tile
    # the hidden dim and accumulate in an f32 scratch.
    if tile_h is None:
        th = d_hidden
        if _vmem_estimate(tr, d_hidden, d_in, x_isz, o_isz, w_isz, mxu_isz,
                          tiled=False) > budget:
            th = _pick_tile(d_hidden, 512, 128)
    else:
        th = _pick_tile(d_hidden, int(tile_h), 128)
    tiled = th != d_hidden

    est = _vmem_estimate(tr, th, d_in, x_isz, o_isz, w_isz, mxu_isz, tiled)
    while est > budget and tr > 64:
        tr = max(64, _round_up(tr // 2, 8))
        est = _vmem_estimate(tr, th, d_in, x_isz, o_isz, w_isz, mxu_isz, tiled)
    while est > budget and th > 128:
        nxt = _pick_tile(d_hidden, th // 2, 128)
        if nxt == th:
            break
        th, tiled = nxt, (nxt != d_hidden)
        est = _vmem_estimate(tr, th, d_in, x_isz, o_isz, w_isz, mxu_isz, tiled)

    n_row_tiles = -(-n_rows // tr)        # cdiv; last row block may be partial
    k_steps = d_hidden // th if tiled else 1

    w_stream = n_row_tiles if tiled else 1
    cost = pl.CostEstimate(
        flops=4 * n_rows * d_in * d_hidden,            # two matmuls
        transcendentals=n_rows * d_hidden,             # one activation per hidden elem
        bytes_accessed=(int(x2.size) * x_isz + n_rows * d_in * o_isz
                        + (int(w_in.size) + int(w_out.size)) * w_isz * w_stream
                        + (d_hidden + d_in) * 4),
    )
    vmem_limit = int(min(max(est * 1.4, 16 * 1024 * 1024), budget))

    cast_x = jnp.dtype(mxu_dtype) != jnp.dtype(x2.dtype)

    if not tiled:
        # ---- resident-weights path: single grid axis over row tiles ----------
        def kernel(x_ref, w_in_ref, b_in_ref, w_out_ref, b_out_ref, o_ref):
            h = jnp.dot(x_ref[...].astype(mxu_dtype), w_in_ref[...],
                        preferred_element_type=jnp.float32)
            h = fn(h + b_in_ref[...])
            y = jnp.dot(h.astype(mxu_dtype), w_out_ref[...],
                        preferred_element_type=jnp.float32)
            o_ref[...] = (y + b_out_ref[...]).astype(o_ref.dtype)

        grid = (n_row_tiles,)
        in_specs = [
            pl.BlockSpec((tr, d_in), lambda i: (i, 0)),           # x rows
            pl.BlockSpec((d_in, d_hidden), lambda i: (0, 0)),     # w_in (resident)
            pl.BlockSpec((1, d_hidden), lambda i: (0, 0)),        # b_in
            pl.BlockSpec((d_hidden, d_in), lambda i: (0, 0)),     # w_out (resident)
            pl.BlockSpec((1, d_in), lambda i: (0, 0)),            # b_out
        ]
        out_specs = pl.BlockSpec((tr, d_in), lambda i: (i, 0))
        scratch_shapes = []
        dim_sem = ("parallel",)
    else:
        # ---- hidden-tiled path: f32 accumulator over the k axis --------------
        def kernel(x_ref, w_in_ref, b_in_ref, w_out_ref, b_out_ref, o_ref, *scratch):
            if cast_x:
                xb_ref, acc_ref = scratch
            else:
                (acc_ref,) = scratch
                xb_ref = x_ref
            k = pl.program_id(1)

            @pl.when(k == 0)
            def _():
                acc_ref[...] = jnp.zeros_like(acc_ref)
                if cast_x:
                    xb_ref[...] = x_ref[...].astype(xb_ref.dtype)

            # project_in partial: (tr, d_in) @ (d_in, th) -> f32 (tr, th)
            h = jnp.dot(xb_ref[...], w_in_ref[...],
                        preferred_element_type=jnp.float32)
            h = fn(h + b_in_ref[...])
            # project_out partial accumulation: (tr, th) @ (th, d_in)
            acc_ref[...] += jnp.dot(h.astype(mxu_dtype), w_out_ref[...],
                                    preferred_element_type=jnp.float32)

            @pl.when(k == pl.num_programs(1) - 1)
            def _():
                o_ref[...] = (acc_ref[...] + b_out_ref[...]).astype(o_ref.dtype)

        grid = (n_row_tiles, k_steps)
        in_specs = [
            pl.BlockSpec((tr, d_in), lambda i, k: (i, 0)),        # x rows
            pl.BlockSpec((d_in, th), lambda i, k: (0, k)),        # w_in H-tile
            pl.BlockSpec((1, th), lambda i, k: (0, k)),           # b_in H-tile
            pl.BlockSpec((th, d_in), lambda i, k: (k, 0)),        # w_out H-tile
            pl.BlockSpec((1, d_in), lambda i, k: (0, 0)),         # b_out
        ]
        out_specs = pl.BlockSpec((tr, d_in), lambda i, k: (i, 0))
        scratch_shapes = ([pltpu.VMEM((tr, d_in), mxu_dtype)] if cast_x else []) \
                         + [pltpu.VMEM((tr, d_in), jnp.float32)]
        dim_sem = ("parallel", "arbitrary")

    out2 = pl.pallas_call(
        kernel,
        out_shape=jax.ShapeDtypeStruct((n_rows, d_in), out_dtype),
        grid_spec=pltpu.PrefetchScalarGridSpec(
            num_scalar_prefetch=0,
            grid=grid,
            in_specs=in_specs,
            out_specs=out_specs,
            scratch_shapes=scratch_shapes,
        ),
        compiler_params=pltpu.CompilerParams(
            dimension_semantics=dim_sem,
            vmem_limit_bytes=vmem_limit,
        ),
        cost_estimate=cost,
    )(x2, w_in, b_in2, w_out, b_out2)

    return out2.reshape(orig_shape)


def reference_project_in_out(x, w_in, b_in, w_out, b_out, fn=_gelu_tanh):
    """Plain-JAX replica of ProjectInOut.forward (fn elementwise)."""
    h = jnp.einsum("...d,dh->...h", x, w_in) + b_in
    h = fn(h)
    return jnp.einsum("...h,hd->...d", h, w_out) + b_out


if __name__ == "__main__":
    B, N, D_IN, D_OUT = 2, 64, 128, 256   # dim_in=128, dim_out=256

    key = jax.random.PRNGKey(0)
    kx, k1, k2, k3, k4 = jax.random.split(key, 5)

    x = jax.random.normal(kx, (B, N, D_IN), dtype=jnp.float32)
    # deterministic synthetic parameters (stand-ins for nn.Linear weights)
    w_in = jax.random.normal(k1, (D_IN, D_OUT), dtype=jnp.float32) * (1.0 / jnp.sqrt(D_IN))
    b_in = jax.random.normal(k2, (D_OUT,), dtype=jnp.float32) * 0.01
    w_out = jax.random.normal(k3, (D_OUT, D_IN), dtype=jnp.float32) * (1.0 / jnp.sqrt(D_OUT))
    b_out = jax.random.normal(k4, (D_IN,), dtype=jnp.float32) * 0.01

    # 1) resident-weights path (auto tiles), exact f32 MXU + erf GELU (torch parity)
    ref_erf = reference_project_in_out(x, w_in, b_in, w_out, b_out, fn=_gelu_exact)
    out_f32 = project_in_out(x, w_in, b_in, w_out, b_out,
                             fn=_gelu_exact, mxu_dtype=jnp.float32)
    out_f32 = jax.block_until_ready(out_f32)
    assert out_f32.shape == x.shape
    assert jnp.allclose(out_f32, ref_erf, atol=1e-4, rtol=1e-4), "f32 resident mismatch"

    # 2) hidden-tiled path (forces K axis + accumulator), bf16 MXU + tanh GELU
    ref_tanh = reference_project_in_out(x, w_in, b_in, w_out, b_out, fn=_gelu_tanh)
    out_bf16 = project_in_out(x, w_in, b_in, w_out, b_out, tile_h=128)
    out_bf16 = jax.block_until_ready(out_bf16)
    assert jnp.allclose(out_bf16, ref_tanh, atol=5e-2, rtol=5e-2), "bf16 tiled mismatch"

    # 3) ragged row count (n_rows % tile_rows != 0) -> masked partial row block
    x_rag = jax.random.normal(kx, (2, 37, D_IN), dtype=jnp.float32)
    ref_rag = reference_project_in_out(x_rag, w_in, b_in, w_out, b_out, fn=_gelu_tanh)
    out_rag = project_in_out(x_rag, w_in, b_in, w_out, b_out, mxu_dtype=jnp.float32)
    out_rag = jax.block_until_ready(out_rag)
    assert out_rag.shape == x_rag.shape
    assert jnp.allclose(out_rag, ref_rag, atol=1e-4, rtol=1e-4), "ragged-row mismatch"

    print("KERNEL_OK")
</pallas_src>

<mosaic_0001>
module attributes {stable_mosaic.version = 11 : i64} {
  func.func @kernel(%arg0: i32, %arg1: memref<64x128xf32, #tpu.memory_space<vmem>>, %arg2: memref<128x256xf32, #tpu.memory_space<vmem>>, %arg3: memref<1x256xf32, #tpu.memory_space<vmem>>, %arg4: memref<256x128xf32, #tpu.memory_space<vmem>>, %arg5: memref<1x128xf32, #tpu.memory_space<vmem>>, %arg6: memref<64x128xf32, #tpu.memory_space<vmem>>) attributes {dimension_semantics = [#tpu.dimension_semantics<parallel>], iteration_bounds = array<i64: 2>, scalar_prefetch = 0 : i64, scratch_operands = 0 : i64, tpu.core_type = #tpu.core_type<tc>, window_params = [{transform_indices = @transform_0, window_bounds = array<i64: 64, 128>}, {pipeline_mode = #tpu.pipeline_mode<synchronous>, transform_indices = @transform_1, window_bounds = array<i64: 128, 256>}, {pipeline_mode = #tpu.pipeline_mode<synchronous>, transform_indices = @transform_2, window_bounds = array<i64: 1, 256>}, {pipeline_mode = #tpu.pipeline_mode<synchronous>, transform_indices = @transform_3, window_bounds = array<i64: 256, 128>}, {pipeline_mode = #tpu.pipeline_mode<synchronous>, transform_indices = @transform_4, window_bounds = array<i64: 1, 128>}, {transform_indices = @transform_5, window_bounds = array<i64: 64, 128>}]} {
    %c0 = arith.constant 0 : index
    %c0_0 = arith.constant 0 : index
    %0 = vector.load %arg1[%c0, %c0_0] : memref<64x128xf32, #tpu.memory_space<vmem>>, vector<64x128xf32>
    %c0_1 = arith.constant 0 : index
    %c0_2 = arith.constant 0 : index
    %1 = vector.load %arg2[%c0_1, %c0_2] : memref<128x256xf32, #tpu.memory_space<vmem>>, vector<128x256xf32>
    %cst = arith.constant dense<0.000000e+00> : vector<64x256xf32>
    %2 = tpu.matmul %0, %1, %cst {dimension_numbers = #tpu.dot_dimension_numbers<[1], [0], [0], [1], [0, 0, 1, 1], [], []>} : vector<64x128xf32>, vector<128x256xf32>, vector<64x256xf32> -> vector<64x256xf32>
    %c0_3 = arith.constant 0 : index
    %c0_4 = arith.constant 0 : index
    %3 = vector.load %arg3[%c0_3, %c0_4] : memref<1x256xf32, #tpu.memory_space<vmem>>, vector<1x256xf32>
    %4 = vector.broadcast %3 : vector<1x256xf32> to vector<64x256xf32>
    %5 = arith.addf %2, %4 : vector<64x256xf32>
    %cst_5 = arith.constant 5.000000e-01 : f32
    %6 = vector.broadcast %cst_5 : f32 to vector<64x256xf32>
    %7 = arith.mulf %6, %5 : vector<64x256xf32>
    %cst_6 = arith.constant 0.707106769 : f32
    %8 = vector.broadcast %cst_6 : f32 to vector<64x256xf32>
    %9 = arith.mulf %5, %8 : vector<64x256xf32>
    %10 = math.erf %9 : vector<64x256xf32>
    %cst_7 = arith.constant 1.000000e+00 : f32
    %11 = vector.broadcast %cst_7 : f32 to vector<64x256xf32>
    %12 = arith.addf %11, %10 : vector<64x256xf32>
    %13 = arith.mulf %7, %12 : vector<64x256xf32>
    %c0_8 = arith.constant 0 : index
    %c0_9 = arith.constant 0 : index
    %14 = vector.load %arg4[%c0_8, %c0_9] : memref<256x128xf32, #tpu.memory_space<vmem>>, vector<256x128xf32>
    %cst_10 = arith.constant dense<0.000000e+00> : vector<64x128xf32>
    %15 = tpu.matmul %13, %14, %cst_10 {dimension_numbers = #tpu.dot_dimension_numbers<[1], [0], [0], [1], [0, 0, 1, 1], [], []>} : vector<64x256xf32>, vector<256x128xf32>, vector<64x128xf32> -> vector<64x128xf32>
    %c0_11 = arith.constant 0 : index
    %c0_12 = arith.constant 0 : index
    %16 = vector.load %arg5[%c0_11, %c0_12] : memref<1x128xf32, #tpu.memory_space<vmem>>, vector<1x128xf32>
    %17 = vector.broadcast %16 : vector<1x128xf32> to vector<64x128xf32>
    %18 = arith.addf %15, %17 : vector<64x128xf32>
    %c0_13 = arith.constant 0 : index
    %c0_14 = arith.constant 0 : index
    %19 = vector.load %arg6[%c0_13, %c0_14] : memref<64x128xf32, #tpu.memory_space<vmem>>, vector<64x128xf32>
    tpu.vector_store %arg6[%c0_13, %c0_14], %18 {strides = array<i32>} : memref<64x128xf32, #tpu.memory_space<vmem>>, vector<64x128xf32>,
    return
  }
  func.func @transform_0(%arg0: i32) -> (i32, i32) {
    %c0_i32 = arith.constant 0 : i32
    %c0_i32_0 = arith.constant 0 : i32
    return %arg0, %c0_i32 : i32, i32
  }
  func.func @transform_1(%arg0: i32) -> (i32, i32) {
    %c0_i32 = arith.constant 0 : i32
    %c0_i32_0 = arith.constant 0 : i32
    %c0_i32_1 = arith.constant 0 : i32
    return %c0_i32, %c0_i32_0 : i32, i32
  }
  func.func @transform_2(%arg0: i32) -> (i32, i32) {
    %c0_i32 = arith.constant 0 : i32
    %c0_i32_0 = arith.constant 0 : i32
    %c0_i32_1 = arith.constant 0 : i32
    return %c0_i32, %c0_i32_0 : i32, i32
  }
  func.func @transform_3(%arg0: i32) -> (i32, i32) {
    %c0_i32 = arith.constant 0 : i32
    %c0_i32_0 = arith.constant 0 : i32
    %c0_i32_1 = arith.constant 0 : i32
    return %c0_i32, %c0_i32_0 : i32, i32
  }
  func.func @transform_4(%arg0: i32) -> (i32, i32) {
    %c0_i32 = arith.constant 0 : i32
    %c0_i32_0 = arith.constant 0 : i32
    %c0_i32_1 = arith.constant 0 : i32
    return %c0_i32, %c0_i32_0 : i32, i32
  }
  func.func @transform_5(%arg0: i32) -> (i32, i32) {
    %c0_i32 = arith.constant 0 : i32
    %c0_i32_0 = arith.constant 0 : i32
    return %arg0, %c0_i32 : i32, i32
  }
}

</mosaic_0001>

<bundles_post_ra>
// kernel: tpu_custom_call.1
= control target key start
LH: loop header
LB: loop body
LE: loop exit
PB: predicated region body
PF: predicated region fallthrough
CT: control target
= control target key end

     0   :  { %10 = vsyncpa [#allocation3], 0  ;;  %s1534_s0 = inlined_call_operand.hbm [shape: f32[128,128], index: 0, kind: input, shape index: {}]   ;;  %s1535_s1 = inlined_call_operand.hbm [shape: f32[128,256], index: 1, kind: input, shape index: {}]   ;;  %s1536_s2 = inlined_call_operand.vmem [shape: f32[1,256], index: 2, kind: input, shape index: {}]   ;;  %s1537_s3 = inlined_call_operand.hbm [shape: f32[256,128], index: 3, kind: input, shape index: {}]   ;;  %s1538_s4 = inlined_call_operand.vmem [shape: f32[1,128], index: 4, kind: input, shape index: {}]   ;;  %s1539_s5 = inlined_call_operand.hbm [shape: f32[128,128], index: 5, kind: output, shape index: {}]  }
   0x1   :  { %12 = vsyncpa [#allocation3 + $0x1], 0 }
   0x2   :  { %13 = vsyncpa [#allocation6], 0 }
   0x3   :  { %14 = vsyncpa [#allocation4], 0 }
   0x4   :  { %16 = vsyncpa [#allocation4 + $0x1], 0  ;;  %s1223_s18 = smov 0   ;;  %s1225_s19 = smov 0  }
   0x5   :  { %s1227_s20 = smov 0   ;;  %s1229_s21 = smov 0  }
   0x6 LB: > { %s1244_s22 = sadd.s32 4294967295, %s1180_s21   ;;  %s777_s23 = sadd.s32 4294967294, %s1180_s21   ;;  %s1180_s21 = sphi %s1229_s21, %s1559_s21   ;;  %s1176_s20 = sphi %s1227_s20, %s1558_s20   ;;  %s1172_s19 = sphi %s1225_s19, %s1557_s19   ;;  %s1168_s18 = sphi %s1223_s18, %s1556_s18  }
   0x7   : > { %p42_p0 = scmp.ne.s32.totalorder %s1172_s19, %s1168_s18  ;;  %p1540_p1 = scmp.eq.s32.totalorder %s1244_s22, 0 }
   0x8   : > { %p156_p3 = scmp.eq.s32.totalorder %s777_s23, 1  ;;  %p778_p5 = scmp.ge.s32.totalorder %s1180_s21, 1 }
   0x9   : > { %p1253_p4 = por %p1540_p1, %p42_p0  ;;  %p163_p7 = scmp.lt.s32.totalorder %s1180_s21, 3 }
   0xa   : > { %p1258_p6 = por %p156_p3, %p42_p0  ;;  %s1182_s27 = smov [#allocation5]  }
   0xb   : > { %s1543_s24 = scalar_select %p1253_p4, 1, 0 }
   0xc   : > { %s1544_s25 = scalar_select %p1258_p6, 1, 0 }
   0xd   : > { %p1263_p8 = pnand %p778_p5, %p163_p7  ;;  %s175_s28 = sshll.u32 %s1182_s27, 4  ;;  %s1267_s28 = int_to_ptr.vmem [resolvable:$true] %s175_s28 }
   0xe   : > { %s1183_s30 = smov [#allocation7]   ;;  %s1024_s9 = scalar_lea.hbm %s1535_s1, 4096 }
   0xf   : > { %p930_p9 = pneg %p1263_p8  ;;  %s191_s6 = sshll.u32 %s1183_s30, 4  ;;  %s1278_s6 = int_to_ptr.vmem [resolvable:$true] %s191_s6 }
  0x10   : > { %p1025_p12 = scmp.ne.s32.totalorder %s1535_s1, %s1024_s9  ;;  %p1031_p5 = scmp.lt.u32.totalorder %s1024_s9, %s1535_s1 }
  0x11   : > { %p1274_p11 = pnand %p930_p9, %p1540_p1 }
  0x13   : > { %p1026_p13 = pneg %p1274_p11 }
  0x15   : > { %p1027_p0 = pnand %p1026_p13, %p1025_p12 }
  0x17   : > { %p1028_p3 = pneg %p1027_p0 }
  0x19   : > { %p1033_p7 = pnand %p1031_p5, %p1028_p3 }
  0x1b   : > { %1036 = shalt.err (!%p1033_p7)
}
  0x1c   : > { %s1037_s14 = scalar_lea.vmem %s1267_s28, 4096  ;;  %p1045_p2 = scmp.lt.s32.totalorder %s1267_s28, %s1267_s28 }
  0x1d   : > { %p1038_p9 = scmp.ne.s32.totalorder %s1267_s28, %s1037_s14  ;;  %p1046_p12 = scmp.lt.s32.totalorder %s1037_s14, %s1037_s14 }
  0x1f   : > { %p1040_p10 = pnand %p1038_p9, %p1026_p13  ;;  %p1047_p0 = por %p1046_p12, %p1045_p2 }
  0x21   : > { %p1041_p1 = pneg %p1040_p10 }
  0x23   : > { %p1048_p6 = pnand %p1047_p0, %p1041_p1 }
  0x25   : > { %1051 = shalt.err (!%p1048_p6)
}
  0x26   : > { %s1184_s15 = smov 256   ;;  %s1185_s16 = smov 16  }
  0x27   : > { %933 = dma.hbm_to_vmem [thread:$0]  (!%p1274_p11), %s1535_s1, 4096, %s1267_s28, [#allocation6], %s1184_s15, %s1184_s15, %s1185_s16  }
  0x28   : > { %s1052_s7 = scalar_lea.hbm %s1537_s3, 4096 }
  0x29   : > { %p1053_p2 = scmp.ne.s32.totalorder %s1537_s3, %s1052_s7  ;;  %p1059_p10 = scmp.lt.u32.totalorder %s1052_s7, %s1537_s3 }
  0x2b   : > { %p1055_p1 = pnand %p1053_p2, %p1026_p13 }
  0x2d   : > { %p1056_p6 = pneg %p1055_p1 }
  0x2f   : > { %p1061_p3 = pnand %p1059_p10, %p1056_p6 }
  0x31   : > { %1064 = shalt.err (!%p1061_p3)
}
  0x32   : > { %s1065_s28 = scalar_lea.vmem %s1278_s6, 4096  ;;  %p1073_p12 = scmp.lt.s32.totalorder %s1278_s6, %s1278_s6 }
  0x33   : > { %p1066_p5 = scmp.ne.s32.totalorder %s1278_s6, %s1065_s28  ;;  %p1074_p0 = scmp.lt.s32.totalorder %s1065_s28, %s1065_s28 }
  0x35   : > { %p1068_p7 = pnand %p1066_p5, %p1026_p13  ;;  %p1075_p2 = por %p1074_p0, %p1073_p12 }
  0x37   : > { %p1069_p9 = pneg %p1068_p7 }
  0x39   : > { %p1076_p1 = pnand %p1075_p2, %p1069_p9 }
  0x3b   : > { %1079 = shalt.err (!%p1076_p1)
}
  0x3c   : > { %s1186_s12 = smov 128   ;;  %s1187_s13 = smov 8  }
  0x3d   : > { %936 = dma.hbm_to_vmem [thread:$0]  (!%p1274_p11), %s1537_s3, 4096, %s1278_s6, [#allocation6], %s1186_s12, %s1186_s12, %s1187_s13  }
  0x3e   : > { %s1336_s16 = sadd.s32 1, %s1180_s21   ;;  %s29_s23 = sadd.s32 1, %s1176_s20 }
  0x3f   : > { %s26_s17 = ssub.s32 %s1180_s21, %s1336_s16  ;;  %p36_p6 = scmp.ne.s32.totalorder %s1176_s20, %s1172_s19 }
  0x40   : > { %p27_p13 = scmp.eq.s32.totalorder %s26_s17, 0  ;;  %p37_p10 = scmp.eq.s32.totalorder %s1180_s21, 0 }
  0x41   : > { %p1547_p5 = scmp.eq.s32.totalorder %s1244_s22, 1  ;;  %p947_p9 = scmp.lt.s32.totalorder %s1180_s21, 2 }
  0x42   : > { %s1345_s27 = scalar_select %p27_p13, %s1176_s20, %s29_s23  }
  0x43   : > { %p38_p3 = por %p37_p10, %p36_p6  ;;  %p1349_p7 = por %p1547_p5, %p36_p6 }
  0x44   : > { %s208_s30 = sand.u32 1, %s1176_s20   ;;  %s796_s6 = sshll.u32 %s1180_s21, 10 }
  0x45   : > { %s1548_s29 = scalar_select %p1349_p7, 1, 0 }
  0x46   : > { %s782_s7 = sshll.u32 %s208_s30, 6  ;;  %s1359_s10 = scalar_lea.hbm %s1534_s0, %s796_s6 }
  0x47   : > { %s212_s11 = scalar_lea.vmem [#allocation2], %s782_s7  ;;  %p1363_p11 = pnand %p947_p9, %p38_p3 }
  0x48   : > { %s219_s28 = sshll.u32 %s212_s11, 4  ;;  %s1367_s15 = scalar_lea.sflag [#allocation3], %s208_s30  ;;  %s1361_s28 = int_to_ptr.vmem [resolvable:$true] %s219_s28 }
  0x49   : > { %s1080_s17 = scalar_lea.hbm %s1359_s10, 1024  ;;  %p1082_p0 = pneg %p1363_p11 }
  0x4a   : > { %p1081_p12 = scmp.ne.s32.totalorder %s1359_s10, %s1080_s17  ;;  %s1085_s6 = scalar_lea.hbm %s1534_s0, 2048 }
  0x4b   : > { %p1086_p13 = scmp.lt.u32.totalorder %s1359_s10, %s1534_s0  ;;  %p1087_p6 = scmp.lt.u32.totalorder %s1085_s6, %s1080_s17 }
  0x4c   : > { %p1083_p2 = pnand %p1082_p0, %p1081_p12  ;;  %p1089_p3 = scmp.lt.u32.totalorder %s1080_s17, %s1359_s10 }
  0x4d   : > { %p1088_p10 = por %p1087_p6, %p1086_p13 }
  0x4e   : > { %p1084_p1 = pneg %p1083_p2 }
  0x4f   : > { %p1090_p5 = por %p1089_p3, %p1088_p10 }
  0x51   : > { %p1091_p9 = pnand %p1090_p5, %p1084_p1 }
  0x53   : > { %1094 = shalt.err (!%p1091_p9)
}
  0x54   : > { %s1095_s30 = scalar_lea.vmem %s1361_s28, 1024  ;;  %s1188_s11 = smov [#allocation2]  }
  0x55   : > { %p1096_p12 = scmp.ne.s32.totalorder %s1361_s28, %s1095_s30  ;;  %s1100_s23 = sshll.u32 %s1188_s11, 4  ;;  %s1101_s23 = int_to_ptr.vmem [resolvable:$false] %s1100_s23 }
  0x56   : > { %s1102_s7 = scalar_lea.vmem %s1101_s23, 2048  ;;  %p1103_p4 = scmp.lt.s32.totalorder %s1361_s28, %s1101_s23 }
  0x57   : > { %p1098_p2 = pnand %p1096_p12, %p1082_p0  ;;  %p1104_p13 = scmp.lt.s32.totalorder %s1102_s7, %s1095_s30 }
  0x59   : > { %p1099_p7 = pneg %p1098_p2  ;;  %p1105_p6 = por %p1104_p13, %p1103_p4 }
  0x5b   : > { %p1106_p10 = pnand %p1105_p6, %p1099_p7 }
  0x5d   : > { %1109 = shalt.err (!%p1106_p10)
}
  0x5e   : > { %940 = dma.hbm_to_vmem [thread:$0]  (!%p1363_p11), %s1359_s10, 1024, %s1361_s28, %s1367_s15, %s1186_s12, %s1186_s12, %s1187_s13  }
  0x5f   : > { %231 = sbr.rel (%p1263_p8) target bundleno = 634 (0x27a), region = 40  ;;  %s1401_s17 = sand.u32 (!%p1263_p8), 1, %s1172_s19  }
  0x60   : > { %s786_s6 = sshll.u32 (!%p1263_p8), %s1401_s17, 6  ;;  %s234_s8 = scalar_lea.sflag (!%p1263_p8), [#allocation3], %s1401_s17 }
  0x61   : > { %s1407_s14 = scalar_lea.vmem (!%p1263_p8), [#allocation2], %s786_s6  ;;  %p1550_p4 = scmp.ne.s32.totalorder (!%p1263_p8), %s1543_s24, 0 }
  0x66   : > { %1155 = dma.done.wait (%p1550_p4), %s234_s8, 1024  }
  0x67   : > { %1157 = vsyncadd (%p1550_p4), %s234_s8, 4294966272  ;;  %p1551_p7 = scmp.eq.s32.totalorder %s1244_s22, 0 }
  0x69   : > { %1159 = dma.done.wait (%p1551_p7), [#allocation6], 8192   ;;  %p1552_p8 = pmov %p1551_p7 }
  0x6a   : > { %v1189_v0 = vmov 0.0   ;;  %v283_v1 = vld [vmem:[#allocation5 + $0x8] sm:$0xff]  ;;  %v285_v2 = vld [vmem:[#allocation5 + $0x18] sm:$0xff]  ;;  %v282_v3 = vld [vmem:[#allocation5] sm:$0xff]  ;;  %s1473_s10 = scalar_lea.vmem [#allocation8], %s786_s6  ;;  %s797_s15 = sshll.u32 %s1244_s22, 10 }
  0x6b   : > { %1161 = vsyncadd (%p1552_p8), [#allocation6], 4294959104  ;;  %390 = vmatprep.mubr.f32.mxu0 %v1189_v0  ;;  %v854_v4 = vpack.c.bf16 %v285_v2, %v283_v1  ;;  %v284_v5 = vld [vmem:[#allocation5 + $0x10] sm:$0xff]  ;;  %v287_v6 = vld [vmem:[#allocation5 + $0x28] sm:$0xff]  ;;  %s685_s28 = sshll.u32 %s1473_s10, 4  ;;  %s1489_s11 = scalar_lea.hbm %s1539_s5, %s797_s15  ;;  %s1483_s28 = int_to_ptr.vmem [resolvable:$true] %s685_s28 }
  0x6c   : > { %v289_v7 = vld [vmem:[#allocation5 + $0x38] sm:$0xff]  ;;  %v856_v8 = vpack.c.bf16 %v284_v5, %v282_v3  ;;  %v286_v10 = vld [vmem:[#allocation5 + $0x20] sm:$0xff]  ;;  %v288_v11 = vld [vmem:[#allocation5 + $0x30] sm:$0xff]  ;;  %s672_s23 = scalar_lea.sflag [#allocation4], %s1401_s17  ;;  %s1110_s7 = scalar_lea.vmem %s1483_s28, 1024 }
  0x6d   : > { %v858_v9 = vpack.c.bf16 %v289_v7, %v287_v6  ;;  %v291_v12 = vld [vmem:[#allocation5 + $0x48] sm:$0xff]  ;;  %855 = vmatprep.subr.bf16.mxu0 %v854_v4  ;;  %v293_v13 = vld [vmem:[#allocation5 + $0x58] sm:$0xff]  ;;  %v860_v14 = vpack.c.bf16 %v288_v11, %v286_v10  ;;  %v290_v16 = vld [vmem:[#allocation5 + $0x40] sm:$0xff]  ;;  %p1111_p11 = scmp.ne.s32.totalorder %s1483_s28, %s1110_s7  ;;  %p1553_p0 = scmp.ne.s32.totalorder %s1548_s29, 0 }
  0x6e   : > { %857 = vmatpush1.bf16.msra.mxu0 %v856_v8  ;;  %v862_v15 = vpack.c.bf16 %v293_v13, %v291_v12  ;;  %v292_v17 = vld [vmem:[#allocation5 + $0x50] sm:$0xff]  ;;  %v295_v18 = vld [vmem:[#allocation5 + $0x68] sm:$0xff]  ;;  %v297_v19 = vld [vmem:[#allocation5 + $0x78] sm:$0xff]  ;;  %s1190_s22 = smov [#allocation8]  }
  0x6f   : > { %859 = vmatprep.subr.bf16.mxu0 %v858_v9  ;;  %v864_v20 = vpack.c.bf16 %v292_v17, %v290_v16  ;;  %v866_v21 = vpack.c.bf16 %v297_v19, %v295_v18  ;;  %v294_v22 = vld [vmem:[#allocation5 + $0x60] sm:$0xff]  ;;  %v296_v23 = vld [vmem:[#allocation5 + $0x70] sm:$0xff]  ;;  %v299_v24 = vld [vmem:[#allocation5 + $0x88] sm:$0xff]  ;;  %p1112_p1 = pnand %p1111_p11, %p1553_p0  ;;  %s1114_s6 = sshll.u32 %s1190_s22, 4  ;;  %s1115_s6 = int_to_ptr.vmem [resolvable:$false] %s1114_s6 }
  0x70   : > { %v301_v25 = vld [vmem:[#allocation5 + $0x98] sm:$0xff]  ;;  %v868_v26 = vpack.c.bf16 %v296_v23, %v294_v22  ;;  %v298_v27 = vld [vmem:[#allocation5 + $0x80] sm:$0xff]  ;;  %v300_v28 = vld [vmem:[#allocation5 + $0x90] sm:$0xff]  ;;  %s1116_s8 = scalar_lea.vmem %s1115_s6, 2048  ;;  %p1117_p5 = scmp.lt.s32.totalorder %s1483_s28, %s1115_s6 }
  0x71   : > { %v303_v29 = vld [vmem:[#allocation5 + $0xa8] sm:$0xff]  ;;  %v870_v30 = vpack.c.bf16 %v301_v25, %v299_v24  ;;  %v305_v31 = vld [vmem:[#allocation5 + $0xb8] sm:$0xff]  ;;  %v535_v32 = vld [vmem:[#allocation7 + $0x80] sm:$0xff]  ;;  %v872_v42 = vpack.c.bf16 %v300_v28, %v298_v27  ;;  %p1113_p3 = pneg %p1112_p1  ;;  %p1118_p9 = scmp.lt.s32.totalorder %s1116_s8, %s1110_s7 }
  0x72   : > { %861 = vmatpush1.bf16.msra.mxu0 %v860_v14  ;;  %v536_v33 = vld [vmem:[#allocation7 + $0x88] sm:$0xff]  ;;  %v519_v35 = vld [vmem:[#allocation7] sm:$0xff]  ;;  %v537_v37 = vld [vmem:[#allocation7 + $0x90] sm:$0xff]  ;;  %v874_v46 = vpack.c.bf16 %v305_v31, %v303_v29 }
  0x73   : > { %863 = vmatprep.subr.bf16.mxu0 %v862_v15  ;;  %v886_v34 = vpack.c.bf16 %v536_v33, %v535_v32  ;;  %v520_v36 = vld [vmem:[#allocation7 + $0x8] sm:$0xff]  ;;  %v538_v39 = vld [vmem:[#allocation7 + $0x98] sm:$0xff]  ;;  %v521_v40 = vld [vmem:[#allocation7 + $0x10] sm:$0xff]  ;;  %p1119_p12 = por %p1118_p9, %p1117_p5 }
  0x74   : > { %v888_v38 = vpack.c.bf16 %v520_v36, %v519_v35  ;;  %v522_v41 = vld [vmem:[#allocation7 + $0x18] sm:$0xff]  ;;  %v890_v43 = vpack.c.bf16 %v538_v39, %v537_v37  ;;  %v539_v44 = vld [vmem:[#allocation7 + $0xa0] sm:$0xff]  ;;  %v540_v45 = vld [vmem:[#allocation7 + $0xa8] sm:$0xff] }
  0x75   : > { %887 = vmatprep.subr.bf16.mxu1 %v886_v34  ;;  %v302_v47 = vld [vmem:[#allocation5 + $0xa0] sm:$0xff]  ;;  %v304_v48 = vld [vmem:[#allocation5 + $0xb0] sm:$0xff]  ;;  %v307_v49 = vld [vmem:[#allocation5 + $0xc8] sm:$0xff]  ;;  %v892_v50 = vpack.c.bf16 %v522_v41, %v521_v40  ;;  %v894_v52 = vpack.c.bf16 %v540_v45, %v539_v44  ;;  %v316_v41 = vlaneseq  ;;  %p1120_p2 = pnand %p1119_p12, %p1113_p3 }
  0x76   : > { %865 = vmatpush1.bf16.msra.mxu0 %v864_v20  ;;  %889 = vmatpush3.bf16.msra.mxu1 %v888_v38  ;;  %v309_v51 = vld [vmem:[#allocation5 + $0xd8] sm:$0xff]  ;;  %v523_v53 = vld [vmem:[#allocation7 + $0x20] sm:$0xff]  ;;  %v524_v54 = vld [vmem:[#allocation7 + $0x28] sm:$0xff]  ;;  %v876_v55 = vpack.c.bf16 %v304_v48, %v302_v47 }
  0x77   : > { %867 = vmatprep.subr.bf16.mxu0 %v866_v21  ;;  %891 = vmatprep.subr.bf16.mxu1 %v890_v43  ;;  %v878_v56 = vpack.c.bf16 %v309_v51, %v307_v49  ;;  %v306_v57 = vld [vmem:[#allocation5 + $0xc0] sm:$0xff]  ;;  %v308_v58 = vld [vmem:[#allocation5 + $0xd0] sm:$0xff]  ;;  %v896_v59 = vpack.c.bf16 %v524_v54, %v523_v53  ;;  %v311_v60 = vld [vmem:[#allocation5 + $0xe8] sm:$0xff] }
  0x78   : > { %v313_v61 = vld [vmem:[#allocation5 + $0xf8] sm:$0xff]  ;;  %v880_v62 = vpack.c.bf16 %v308_v58, %v306_v57  ;;  %v310_v1 = vld [vmem:[#allocation5 + $0xe0] sm:$0xff]  ;;  %v312_v2 = vld [vmem:[#allocation5 + $0xf0] sm:$0xff] }
  0x79   : > { %v882_v63 = vpack.c.bf16 %v313_v61, %v311_v60  ;;  %v884_v3 = vpack.c.bf16 %v312_v2, %v310_v1  ;;  %v274_v4 = vld [vmem:[%s1407_s14] sm:$0xff]  ;;  %v275_v5 = vld [vmem:[%s1407_s14 + $0x8] sm:$0xff]  ;;  %v276_v6 = vld [vmem:[%s1407_s14 + $0x10] sm:$0xff] }
  0x7a   : > { %869 = vmatpush1.bf16.msra.mxu0 %v868_v26  ;;  %893 = vmatpush3.bf16.msra.mxu1 %v892_v50  ;;  %v277_v7 = vld [vmem:[%s1407_s14 + $0x18] sm:$0xff]  ;;  %v278_v8 = vld [vmem:[%s1407_s14 + $0x20] sm:$0xff]  ;;  %v279_v9 = vld [vmem:[%s1407_s14 + $0x28] sm:$0xff] }
  0x7b   : > { %871 = vmatprep.subr.bf16.mxu0 %v870_v30  ;;  %895 = vmatprep.subr.bf16.mxu1 %v894_v52  ;;  %v280_v10 = vld [vmem:[%s1407_s14 + $0x30] sm:$0xff]  ;;  %v281_v11 = vld [vmem:[%s1407_s14 + $0x38] sm:$0xff]  ;;  %v543_v18 = vld [vmem:[#allocation7 + $0xc0] sm:$0xff] }
  0x7c   : > { %v541_v12 = vld [vmem:[#allocation7 + $0xb0] sm:$0xff]  ;;  %v542_v13 = vld [vmem:[#allocation7 + $0xb8] sm:$0xff]  ;;  %v544_v19 = vld [vmem:[#allocation7 + $0xc8] sm:$0xff] }
  0x7d   : > { %v898_v14 = vpack.c.bf16 %v542_v13, %v541_v12  ;;  %v525_v15 = vld [vmem:[#allocation7 + $0x30] sm:$0xff]  ;;  %v526_v16 = vld [vmem:[#allocation7 + $0x38] sm:$0xff]  ;;  %v902_v20 = vpack.c.bf16 %v544_v19, %v543_v18  ;;  %v527_v21 = vld [vmem:[#allocation7 + $0x40] sm:$0xff] }
  0x7e   : > { %873 = vmatpush1.bf16.msra.mxu0 %v872_v42  ;;  %897 = vmatpush3.bf16.msra.mxu1 %v896_v59  ;;  %v900_v17 = vpack.c.bf16 %v526_v16, %v525_v15  ;;  %v528_v22 = vld [vmem:[#allocation7 + $0x48] sm:$0xff]  ;;  %v545_v24 = vld [vmem:[#allocation7 + $0xd0] sm:$0xff]  ;;  %v530_v27 = vld [vmem:[#allocation7 + $0x58] sm:$0xff]  ;;  %v317_v42 = vshrl.u32 %v316_v41, 7 }
  0x7f   : > { %875 = vmatprep.subr.bf16.mxu0 %v874_v46  ;;  %899 = vmatprep.subr.bf16.mxu1 %v898_v14  ;;  %v904_v23 = vpack.c.bf16 %v528_v22, %v527_v21  ;;  %v529_v26 = vld [vmem:[#allocation7 + $0x50] sm:$0xff]  ;;  %v547_v29 = vld [vmem:[#allocation7 + $0xe0] sm:$0xff]  ;;  %v548_v30 = vld [vmem:[#allocation7 + $0xe8] sm:$0xff] }
  0x80   : > { %v908_v28 = vpack.c.bf16 %v530_v27, %v529_v26  ;;  %v910_v31 = vpack.c.bf16 %v548_v30, %v547_v29  ;;  %v531_v32 = vld [vmem:[#allocation7 + $0x60] sm:$0xff]  ;;  %v532_v33 = vld [vmem:[#allocation7 + $0x68] sm:$0xff]  ;;  %v549_v35 = vld [vmem:[#allocation7 + $0xf0] sm:$0xff]  ;;  %v318_v43 = vsub.s32 0, %v317_v42  ;;  %v322_v45 = vsub.s32 1, %v317_v42 }
  0x81   : > { %v912_v34 = vpack.c.bf16 %v532_v33, %v531_v32  ;;  %v550_v36 = vld [vmem:[#allocation7 + $0xf8] sm:$0xff]  ;;  %v533_v38 = vld [vmem:[#allocation7 + $0x70] sm:$0xff]  ;;  %v314_v44 = vld [vmem:[%s1536_s2] sm:$0x3] }
  0x82   : > { %877 = vmatpush1.bf16.msra.mxu0 %v876_v55  ;;  %901 = vmatpush3.bf16.msra.mxu1 %v900_v17  ;;  %v914_v37 = vpack.c.bf16 %v550_v36, %v549_v35  ;;  %v534_v39 = vld [vmem:[#allocation7 + $0x78] sm:$0xff]  ;;  %v1436_v46 = vrot.slane %v314_v44, %v318_v43  ;;  %v1438_v47 = vrot.slane %v314_v44, %v322_v45 }
  0x83   : > { %879 = vmatprep.subr.bf16.mxu0 %v878_v56  ;;  %903 = vmatprep.subr.bf16.mxu1 %v902_v20  ;;  %v916_v40 = vpack.c.bf16 %v534_v39, %v533_v38 }
  0x86   : > { %881 = vmatpush1.bf16.msra.mxu0 %v880_v62  ;;  %905 = vmatpush3.bf16.msra.mxu1 %v904_v23 }
  0x87   : > { %883 = vmatprep.subr.bf16.mxu0 %v882_v63 }
  0x8a   : > { %885 = vmatpush1.bf16.msra.mxu0 %v884_v3 }
  0x8d   : > { %391 = vmatmul.mubr.f32.vlgmr.msra.gmra.mrb[0].mxu0 %v274_v4 }
  0x8e   : > { %396 = vmatprep.mubr.f32.mxu0 %v1189_v0 }
  0x91   : > { %397 = vmatmul.mubr.f32.gmra.mrb[2].mxu0 %v275_v5 }
  0x92   : > { %402 = vmatprep.mubr.f32.mxu0 %v1189_v0 }
  0x95   : > { %403 = vmatmul.mubr.f32.gmra.mrb[4].mxu0 %v276_v6 }
  0x96   : > { %408 = vmatprep.mubr.f32.mxu0 %v1189_v0 }
  0x99   : > { %409 = vmatmul.mubr.f32.gmra.mrb[6].mxu0 %v277_v7 }
  0x9a   : > { %414 = vmatprep.mubr.f32.mxu0 %v1189_v0 }
  0x9d   : > { %415 = vmatmul.mubr.f32.gmra.mrb[8].mxu0 %v278_v8 }
  0x9e   : > { %420 = vmatprep.mubr.f32.mxu0 %v1189_v0 }
  0xa1   : > { %421 = vmatmul.mubr.f32.gmra.mrb[10].mxu0 %v279_v9 }
  0xa2   : > { %426 = vmatprep.mubr.f32.mxu0 %v1189_v0 }
  0xa5   : > { %427 = vmatmul.mubr.f32.gmra.mrb[12].mxu0 %v280_v10 }
  0xa6   : > { %432 = vmatprep.mubr.f32.mxu0 %v1189_v0  ;;  %v546_v0 = vld [vmem:[#allocation7 + $0xd8] sm:$0xff] }
  0xa7   : > { %v906_v25 = vpack.c.bf16 %v546_v0, %v545_v24 }
  0xa9   : > { %433 = vmatmul.mubr.f32.gmra.mrb[14].mxu0 %v281_v11  ;;  %907 = vmatprep.subr.bf16.mxu1 %v906_v25 }
  0xaa   : > { %909 = vmatpush3.bf16.msra.mxu1 %v908_v28 }
  0xab   : > { %911 = vmatprep.subr.bf16.mxu1 %v910_v31 }
  0xae   : > { %913 = vmatpush3.bf16.msra.mxu1 %v912_v34 }
  0xaf   : > { %915 = vmatprep.subr.bf16.mxu1 %v914_v37 }
  0xb2   : > { %917 = vmatpush3.bf16.msra.mxu1 %v916_v40 }
 0x160   : > { %v392_v48 = vpop.f32.mrb[0].mxu0 }
 0x161   : > { %v393_v49 = vadd.f32 %v392_v48, %v1436_v46  ;;  %v394_v50 = vpop.f32.mrb[1].mxu0 }
 0x162   : > { %v395_v51 = vadd.f32 %v394_v50, %v1438_v47 }
 0x163   : > { %v455_v52 = vmul.f32 0.70710677, %v393_v49  ;;  %v439_v17 = vmul.f32 0.5, %v393_v49 }
 0x164   : > { %v456_v53 = vmul.f32 0.70710677, %v395_v51  ;;  %v398_v54 = vpop.f32.mrb[2].mxu0  ;;  %v440_v15 = vmul.f32 0.5, %v395_v51 }
 0x165   : > { %992 = verf.f32 %v455_v52  ;;  %v399_v55 = vadd.f32 %v398_v54, %v1436_v46  ;;  %v400_v56 = vpop.f32.mrb[3].mxu0 }
 0x166   : > { %994 = verf.f32 %v456_v53  ;;  %v401_v57 = vadd.f32 %v400_v56, %v1438_v47 }
 0x167   : > { %v457_v58 = vmul.f32 0.70710677, %v399_v55  ;;  %v441_v30 = vmul.f32 0.5, %v399_v55 }
 0x168   : > { %v458_v59 = vmul.f32 0.70710677, %v401_v57  ;;  %v404_v60 = vpop.f32.mrb[4].mxu0  ;;  %v442_v26 = vmul.f32 0.5, %v401_v57 }
 0x169   : > { %996 = verf.f32 %v457_v58  ;;  %v405_v61 = vadd.f32 %v404_v60, %v1436_v46  ;;  %v406_v62 = vpop.f32.mrb[5].mxu0 }
 0x16a   : > { %998 = verf.f32 %v458_v59  ;;  %v407_v63 = vadd.f32 %v406_v62, %v1438_v47 }
 0x16b   : > { %v459_v1 = vmul.f32 0.70710677, %v405_v61  ;;  %v443_v44 = vmul.f32 0.5, %v405_v61 }
 0x16c   : > { %v460_v2 = vmul.f32 0.70710677, %v407_v63  ;;  %v410_v3 = vpop.f32.mrb[6].mxu0  ;;  %v444_v40 = vmul.f32 0.5, %v407_v63 }
 0x16d   : > { %1000 = verf.f32 %v459_v1  ;;  %v1447_v4 = vadd.f32 %v410_v3, %v1436_v46  ;;  %v412_v5 = vpop.f32.mrb[7].mxu0 }
 0x16e   : > { %1002 = verf.f32 %v460_v2  ;;  %v413_v6 = vadd.f32 %v412_v5, %v1438_v47 }
 0x16f   : > { %v993_v7 = vpop.eup %992  ;;  %v461_v8 = vmul.f32 0.70710677, %v1447_v4  ;;  %v445_v60 = vmul.f32 0.5, %v1447_v4 }
 0x170   : > { %v995_v9 = vpop.eup %994  ;;  %v487_v10 = vadd.f32 1.0, %v993_v7  ;;  %v462_v11 = vmul.f32 0.70710677, %v413_v6  ;;  %v416_v12 = vpop.f32.mrb[8].mxu0  ;;  %v446_v56 = vmul.f32 0.5, %v413_v6 }
 0x171   : > { %1004 = verf.f32 %v461_v8  ;;  %v1452_v13 = vadd.f32 %v416_v12, %v1436_v46  ;;  %v418_v14 = vpop.f32.mrb[9].mxu0  ;;  %v488_v16 = vadd.f32 1.0, %v995_v9 }
 0x172   : > { %1006 = verf.f32 %v462_v11  ;;  %v419_v18 = vadd.f32 %v418_v14, %v1438_v47  ;;  %v503_v25 = vmul.f32 %v487_v10, %v439_v17 }
 0x173   : > { %v997_v19 = vpop.eup %996  ;;  %v463_v20 = vmul.f32 0.70710677, %v1452_v13  ;;  %v504_v21 = vmul.f32 %v488_v16, %v440_v15 }
 0x174   : > { %v999_v22 = vpop.eup %998  ;;  %v489_v23 = vadd.f32 1.0, %v997_v19  ;;  %v464_v24 = vmul.f32 0.70710677, %v419_v18  ;;  %v422_v0 = vpop.f32.mrb[10].mxu0  ;;  %v448_v6 = vmul.f32 0.5, %v419_v18 }
 0x175   : > { %v490_v27 = vadd.f32 1.0, %v999_v22  ;;  %1008 = verf.f32 %v463_v20  ;;  %v1457_v28 = vadd.f32 %v422_v0, %v1436_v46  ;;  %v424_v29 = vpop.f32.mrb[11].mxu0  ;;  %622 = vmatprep.mubr.f32.mxu1 %v504_v21 }
 0x176   : > { %1010 = verf.f32 %v464_v24  ;;  %v425_v31 = vadd.f32 %v424_v29, %v1438_v47  ;;  %623 = vmatmul.mubr.f32.vlgmr.msra.gmra.mrb[0].mxu1 %v503_v25  ;;  %v505_v39 = vmul.f32 %v489_v23, %v441_v30 }
 0x177   : > { %v1001_v32 = vpop.eup %1000  ;;  %v465_v33 = vmul.f32 0.70710677, %v1457_v28  ;;  %v506_v34 = vmul.f32 %v490_v27, %v442_v26  ;;  %v449_v15 = vmul.f32 0.5, %v1457_v28 }
 0x178   : > { %v1003_v35 = vpop.eup %1002  ;;  %v491_v36 = vadd.f32 1.0, %v1001_v32  ;;  %v466_v37 = vmul.f32 0.70710677, %v425_v31  ;;  %v428_v38 = vpop.f32.mrb[12].mxu0  ;;  %v450_v12 = vmul.f32 0.5, %v425_v31 }
 0x179   : > { %v492_v41 = vadd.f32 1.0, %v1003_v35  ;;  %1012 = verf.f32 %v465_v33  ;;  %v429_v42 = vadd.f32 %v428_v38, %v1436_v46  ;;  %v430_v43 = vpop.f32.mrb[13].mxu0  ;;  %627 = vmatprep.mubr.f32.mxu1 %v506_v34  ;;  %v790_v33 = vld [vmem:[%s1538_s4] ss:$0 sm:$0xff] }
 0x17a   : > { %1014 = verf.f32 %v466_v37  ;;  %v431_v45 = vadd.f32 %v430_v43, %v1438_v47  ;;  %628 = vmatmul.mubr.f32.gmra.mrb[2].mxu1 %v505_v39  ;;  %v507_v55 = vmul.f32 %v491_v36, %v443_v44 }
 0x17b   : > { %v1005_v48 = vpop.eup %1004  ;;  %v467_v49 = vmul.f32 0.70710677, %v429_v42  ;;  %v508_v50 = vmul.f32 %v492_v41, %v444_v40  ;;  %v451_v22 = vmul.f32 0.5, %v429_v42 }
 0x17c   : > { %v1007_v51 = vpop.eup %1006  ;;  %v493_v52 = vadd.f32 1.0, %v1005_v48  ;;  %v468_v53 = vmul.f32 0.70710677, %v431_v45  ;;  %v434_v54 = vpop.f32.mrb[14].mxu0  ;;  %v452_v21 = vmul.f32 0.5, %v431_v45 }
 0x17d   : > { %v494_v57 = vadd.f32 1.0, %v1007_v51  ;;  %1016 = verf.f32 %v467_v49  ;;  %v435_v58 = vadd.f32 %v434_v54, %v1436_v46  ;;  %v436_v59 = vpop.f32.mrb[15].mxu0  ;;  %632 = vmatprep.mubr.f32.mxu1 %v508_v50  ;;  %v447_v46 = vmul.f32 0.5, %v1452_v13 }
 0x17e   : > { %1018 = verf.f32 %v468_v53  ;;  %v437_v61 = vadd.f32 %v436_v59, %v1438_v47  ;;  %633 = vmatmul.mubr.f32.gmra.mrb[4].mxu1 %v507_v55  ;;  %v509_v7 = vmul.f32 %v493_v52, %v445_v60 }
 0x17f   : > { %v1009_v62 = vpop.eup %1008  ;;  %v469_v63 = vmul.f32 0.70710677, %v435_v58  ;;  %v510_v1 = vmul.f32 %v494_v57, %v446_v56  ;;  %v453_v28 = vmul.f32 0.5, %v435_v58 }
 0x180   : > { %v1011_v2 = vpop.eup %1010  ;;  %v495_v3 = vadd.f32 1.0, %v1009_v62  ;;  %v470_v5 = vmul.f32 0.70710677, %v437_v61  ;;  %v454_v27 = vmul.f32 0.5, %v437_v61 }
 0x181   : > { %v496_v8 = vadd.f32 1.0, %v1011_v2  ;;  %1020 = verf.f32 %v469_v63  ;;  %637 = vmatprep.mubr.f32.mxu1 %v510_v1 }
 0x182   : > { %1022 = verf.f32 %v470_v5  ;;  %638 = vmatmul.mubr.f32.gmra.mrb[6].mxu1 %v509_v7  ;;  %v511_v11 = vmul.f32 %v495_v3, %v447_v46 }
 0x183   : > { %v1013_v4 = vpop.eup %1012  ;;  %v512_v9 = vmul.f32 %v496_v8, %v448_v6 }
 0x184   : > { %v1015_v10 = vpop.eup %1014  ;;  %v497_v47 = vadd.f32 1.0, %v1013_v4 }
 0x185   : > { %v498_v14 = vadd.f32 1.0, %v1015_v10  ;;  %642 = vmatprep.mubr.f32.mxu1 %v512_v9 }
 0x186   : > { %643 = vmatmul.mubr.f32.gmra.mrb[8].mxu1 %v511_v11  ;;  %v513_v20 = vmul.f32 %v497_v47, %v449_v15 }
 0x187   : > { %v1017_v16 = vpop.eup %1016  ;;  %v514_v17 = vmul.f32 %v498_v14, %v450_v12 }
 0x188   : > { %v1019_v18 = vpop.eup %1018  ;;  %v499_v19 = vadd.f32 1.0, %v1017_v16 }
 0x189   : > { %v500_v13 = vadd.f32 1.0, %v1019_v18  ;;  %647 = vmatprep.mubr.f32.mxu1 %v514_v17 }
 0x18a   : > { %648 = vmatmul.mubr.f32.gmra.mrb[10].mxu1 %v513_v20  ;;  %v515_v26 = vmul.f32 %v499_v19, %v451_v22 }
 0x18b   : > { %v1021_v23 = vpop.eup %1020  ;;  %v516_v24 = vmul.f32 %v500_v13, %v452_v21 }
 0x18c   : > { %v1023_v0 = vpop.eup %1022  ;;  %v501_v25 = vadd.f32 1.0, %v1021_v23 }
 0x18d   : > { %v502_v29 = vadd.f32 1.0, %v1023_v0  ;;  %652 = vmatprep.mubr.f32.mxu1 %v516_v24 }
 0x18e   : > { %653 = vmatmul.mubr.f32.gmra.mrb[12].mxu1 %v515_v26  ;;  %v517_v31 = vmul.f32 %v501_v25, %v453_v28 }
 0x18f   : > { %v518_v30 = vmul.f32 %v502_v29, %v454_v27 }
 0x191   : > { %657 = vmatprep.mubr.f32.mxu1 %v518_v30 }
 0x192   : > { %658 = vmatmul.mubr.f32.gmra.mrb[14].mxu1 %v517_v31 }
 0x249   : > { %v830_v32 = vpop.f32.mrb[0].mxu1 }
 0x24a   : > { %v831_v34 = vpop.f32.mrb[1].mxu1 }
 0x24b   : > { %v832_v35 = vadd.f32 %v831_v34, %v830_v32 }
 0x24d   : > { %v625_v36 = vadd.f32 %v832_v35, %v790_v33  ;;  %v833_v37 = vpop.f32.mrb[2].mxu1 }
 0x24e   : > { %v834_v38 = vpop.f32.mrb[3].mxu1 }
 0x24f   : > { %663 = vst [vmem:[%s1473_s10] sm:$0xff] %v625_v36  ;;  %v835_v39 = vadd.f32 %v834_v38, %v833_v37 }
 0x251   : > { %v630_v40 = vadd.f32 %v835_v39, %v790_v33  ;;  %v836_v41 = vpop.f32.mrb[4].mxu1 }
 0x252   : > { %v837_v42 = vpop.f32.mrb[5].mxu1 }
 0x253   : > { %664 = vst [vmem:[%s1473_s10 + $0x8] sm:$0xff] %v630_v40  ;;  %v838_v43 = vadd.f32 %v837_v42, %v836_v41 }
 0x255   : > { %v635_v44 = vadd.f32 %v838_v43, %v790_v33  ;;  %v839_v45 = vpop.f32.mrb[6].mxu1 }
 0x256   : > { %v840_v48 = vpop.f32.mrb[7].mxu1 }
 0x257   : > { %665 = vst [vmem:[%s1473_s10 + $0x10] sm:$0xff] %v635_v44  ;;  %v841_v49 = vadd.f32 %v840_v48, %v839_v45 }
 0x259   : > { %v640_v50 = vadd.f32 %v841_v49, %v790_v33  ;;  %v842_v51 = vpop.f32.mrb[8].mxu1 }
 0x25a   : > { %v843_v52 = vpop.f32.mrb[9].mxu1 }
 0x25b   : > { %666 = vst [vmem:[%s1473_s10 + $0x18] sm:$0xff] %v640_v50  ;;  %v844_v53 = vadd.f32 %v843_v52, %v842_v51 }
 0x25d   : > { %v645_v54 = vadd.f32 %v844_v53, %v790_v33  ;;  %v845_v55 = vpop.f32.mrb[10].mxu1 }
 0x25e   : > { %v846_v56 = vpop.f32.mrb[11].mxu1 }
 0x25f   : > { %667 = vst [vmem:[%s1473_s10 + $0x20] sm:$0xff] %v645_v54  ;;  %v847_v57 = vadd.f32 %v846_v56, %v845_v55 }
 0x261   : > { %v650_v58 = vadd.f32 %v847_v57, %v790_v33  ;;  %v848_v59 = vpop.f32.mrb[12].mxu1 }
 0x262   : > { %v849_v60 = vpop.f32.mrb[13].mxu1 }
 0x263   : > { %668 = vst [vmem:[%s1473_s10 + $0x28] sm:$0xff] %v650_v58  ;;  %v850_v61 = vadd.f32 %v849_v60, %v848_v59 }
 0x265   : > { %v655_v62 = vadd.f32 %v850_v61, %v790_v33  ;;  %v851_v63 = vpop.f32.mrb[14].mxu1 }
 0x266   : > { %v852_v1 = vpop.f32.mrb[15].mxu1 }
 0x267   : > { %669 = vst [vmem:[%s1473_s10 + $0x30] sm:$0xff] %v655_v62  ;;  %v853_v2 = vadd.f32 %v852_v1, %v851_v63 }
 0x269   : > { %v660_v3 = vadd.f32 %v853_v2, %v790_v33 }
 0x26b   : > { %670 = vst [vmem:[%s1473_s10 + $0x38] sm:$0xff] %v660_v3 }
 0x26c   : > { %1123 = shalt.err (!%p1120_p2)
}
 0x26d   : > { %s1124_s14 = scalar_lea.hbm %s1489_s11, 1024  ;;  %s1128_s12 = scalar_lea.hbm %s1539_s5, 2048 }
 0x26e   : > { %p1125_p13 = scmp.ne.s32.totalorder %s1489_s11, %s1124_s14  ;;  %p1129_p4 = scmp.lt.u32.totalorder %s1489_s11, %s1539_s5 }
 0x26f   : > { %p1130_p7 = scmp.lt.u32.totalorder %s1128_s12, %s1124_s14  ;;  %p1132_p11 = scmp.lt.u32.totalorder %s1124_s14, %s1489_s11 }
 0x270   : > { %p1126_p6 = pnand %p1125_p13, %p1553_p0 }
 0x271   : > { %p1131_p8 = por %p1130_p7, %p1129_p4 }
 0x272   : > { %p1127_p10 = pneg %p1126_p6 }
 0x273   : > { %p1133_p1 = por %p1132_p11, %p1131_p8 }
 0x275   : > { %p1134_p3 = pnand %p1133_p1, %p1127_p10 }
 0x277   : > { %1137 = shalt.err (!%p1134_p3)
}
 0x278   : > { %s1191_s15 = smov 128   ;;  %s1192_s9 = smov 8  }
 0x279   : > { %928 = dma.vmem_to_hbm [thread:$0]  (%p1553_p0), %s1483_s28, 1024, %s1489_s11, %s672_s23, %s1191_s15, %s1191_s15, %s1192_s9  }
 0x27a PF: > { %s700_s30 = sand.u32 1, %s1168_s18   ;;  %p1554_p5 = scmp.ne.s32.totalorder %s1544_s25, 0 }
 0x27b   : > { %p1555_p9 = scmp.ge.s32.totalorder %s1180_s21, 2  ;;  %s701_s7 = scalar_lea.sflag [#allocation4], %s700_s30 }
 0x27d   : > { %p942_p12 = pnand %p1555_p9, %p1554_p5 }
 0x27f   : > { %1163 = dma.done.wait (!%p942_p12), %s701_s7, 1024  }
 0x280   : > { %1165 = vsyncadd (!%p942_p12), %s701_s7, 4294966272  ;;  %p19_p2 = scmp.ge.s32.totalorder %s1336_s16, 4   ;;  %s1556_s18 = smov %s1172_s19 }
 0x281   : > { %s1557_s19 = smov %s1176_s20  ;;  %s1558_s20 = smov %s1345_s27 }
 0x282   : > { %s1559_s21 = smov %s1336_s16  ;;  %21 = sbr.rel (!%p19_p2) target bundleno = 6 (0x6), region = 93 }
 0x289   :  { %706 = vsyncpa [#allocation3], 1 }
 0x28a   :  { %708 = vsyncpa [#allocation3 + $0x1], 1 }
 0x28b   :  { %709 = vsyncpa [#allocation6], 1 }
 0x28c   :  { %710 = vsyncpa [#allocation4], 1 }
 0x28d   :  { %712 = vsyncpa [#allocation4 + $0x1], 1 }

</bundles_post_ra>
